<compile_context>
chip_gen: v7x
topology: tpu7x:2x2x1
jax: 0.10.0
libtpu: 0.0.40
codegen_flags: <defaults>
</compile_context>

<pallas_src>
import math

import jax
import jax.numpy as jnp
import numpy as np
from jax import lax
from jax.experimental import pallas as pl
from jax.experimental.pallas import tpu as pltpu


# -----------------------------------------------------------------------------
# Small helpers.
# -----------------------------------------------------------------------------
def _pick_tile(n, candidates):
    """First candidate that divides n; falls back to the full extent."""
    for t in candidates:
        if n >= t and n % t == 0:
            return t
    return n  # block dim == full array dim is always legal


_VMEM_LIMIT_CACHE = None


def _vmem_limit_bytes():
    """Scoped-VMEM limit derived from the chip (v5e/v6e: 128 MiB, v7x: 64 MiB)."""
    global _VMEM_LIMIT_CACHE
    if _VMEM_LIMIT_CACHE is None:
        try:
            cap = int(pltpu.get_tpu_info().vmem_capacity_bytes)
            _VMEM_LIMIT_CACHE = min(cap // 2, 64 * 1024 * 1024)
        except Exception:
            _VMEM_LIMIT_CACHE = 32 * 1024 * 1024  # safe on every generation
    return _VMEM_LIMIT_CACHE


_EXP_BF16_CACHE = None


def _use_bf16_exp():
    """bf16 EUP exp on v6e/v7x; v5e and older have no bf16 EUP -> keep f32 exp."""
    global _EXP_BF16_CACHE
    if _EXP_BF16_CACHE is None:
        try:
            kind = jax.devices()[0].device_kind.lower()
            _EXP_BF16_CACHE = any(t in kind for t in ("v6", "v7", "7x"))
        except Exception:
            _EXP_BF16_CACHE = False
    return _EXP_BF16_CACHE


# -----------------------------------------------------------------------------
# Linear projection kernel: (M, K) @ (K, N) + (1, N), bf16 MXU / f32 accumulate.
# -----------------------------------------------------------------------------
def _linear_kernel(x_ref, w_ref, b_ref, o_ref):
    x = x_ref[...].astype(jnp.bfloat16)   # no-op when the activation is already bf16
    w = w_ref[...].astype(jnp.bfloat16)   # no-op; weights are pre-cast in the wrapper
    acc = jnp.dot(x, w, preferred_element_type=jnp.float32)
    o_ref[...] = (acc + b_ref[...]).astype(o_ref.dtype)


def _linear(x, w, b, out_dtype=jnp.float32):
    """x: (M, K), w: (K, N) bf16, b: (1, N) f32 -> (M, N) out_dtype."""
    M, K = x.shape
    Kw, N = w.shape
    assert K == Kw
    tm = _pick_tile(M, (512, 256, 128, 64, 32))

    # Weight-resident fast path when the weight comfortably fits VMEM; otherwise
    # tile the output columns so the footprint scales (v7x: 64 MiB VMEM).
    # TODO(synk): add a K reduction grid axis (+ f32 acc scratch) if d_model grows
    #             beyond what a (tm, K) x-block / (K, tn) w-block tolerates in VMEM.
    w_bytes = K * N * w.dtype.itemsize
    if w_bytes <= 8 * 1024 * 1024 or N % 128 != 0:
        tn = N
    else:
        tn = _pick_tile(N, (1024, 512, 256, 128))
    n_col, n_row = N // tn, M // tm

    if n_col == 1:
        # Constant blocks -> DMA'd once; single buffer halves their VMEM footprint.
        w_spec = pl.BlockSpec((K, tn), lambda j, i: (0, j), pipeline_mode=pl.Buffered(1))
        b_spec = pl.BlockSpec((1, tn), lambda j, i: (0, j), pipeline_mode=pl.Buffered(1))
    else:
        w_spec = pl.BlockSpec((K, tn), lambda j, i: (0, j))
        b_spec = pl.BlockSpec((1, tn), lambda j, i: (0, j))

    return pl.pallas_call(
        _linear_kernel,
        out_shape=jax.ShapeDtypeStruct((M, N), out_dtype),
        grid_spec=pltpu.PrefetchScalarGridSpec(
            num_scalar_prefetch=0,
            grid=(n_col, n_row),  # column axis outer -> weight block reused across rows
            in_specs=[
                pl.BlockSpec((tm, K), lambda j, i: (i, 0)),
                w_spec,
                b_spec,
            ],
            out_specs=pl.BlockSpec((tm, tn), lambda j, i: (i, j)),
        ),
        compiler_params=pltpu.CompilerParams(
            dimension_semantics=("parallel", "parallel"),
            vmem_limit_bytes=_vmem_limit_bytes(),
        ),
    )(x, w, b)


# -----------------------------------------------------------------------------
# Flash-style attention core (online softmax, resident m/l/acc scratch).
# -----------------------------------------------------------------------------
def _make_flash_kernel(scale, kv_axis, leading_dim, exp_bf16):
    def kernel(q_ref, k_ref, v_ref, o_ref, m_sc, l_sc, acc_sc):
        kv = pl.program_id(kv_axis)

        @pl.when(kv == 0)
        def _init():
            m_sc[...] = jnp.full(m_sc.shape, -jnp.inf, dtype=jnp.float32)
            l_sc[...] = jnp.zeros(l_sc.shape, dtype=jnp.float32)
            acc_sc[...] = jnp.zeros(acc_sc.shape, dtype=jnp.float32)

        if leading_dim:
            q = q_ref[0]   # (tq, depth) bf16
            k = k_ref[0]   # (tk, depth) bf16
            v = v_ref[0]   # (tk, depth) bf16
        else:
            q = q_ref[...]
            k = k_ref[...]
            v = v_ref[...]

        # Fold the softmax 1/sqrt(depth) scale into q (tq*depth muls, not tq*tk).
        q = q * jnp.asarray(scale, dtype=q.dtype)

        # Q @ K^T without materializing a transpose: contract the last dims on
        # the MXU (bf16 inputs, f32 accumulation).
        s = lax.dot_general(
            q, k,
            dimension_numbers=(((1,), (1,)), ((), ())),
            preferred_element_type=jnp.float32,
        )  # (tq, tk) f32

        # TODO(synk): optional `mask` argument of the PyTorch forward is not
        #             plumbed through (mask=None path only).
        m_prev = m_sc[...]
        m_new = jnp.maximum(m_prev, jnp.max(s, axis=-1, keepdims=True))
        alpha = jnp.exp(m_prev - m_new)
        if exp_bf16:
            # v6e/v7x: bf16 EUP exp (~2x throughput); p in [0,1] so the accuracy
            # cost is tiny. m/l statistics and accumulators stay f32.
            p = jnp.exp((s - m_new).astype(jnp.bfloat16))
            p_sum = jnp.sum(p.astype(jnp.float32), axis=-1, keepdims=True)
            pv = jnp.dot(p, v, preferred_element_type=jnp.float32)
        else:
            # v5e and older: f32 exp, cast only for the PV matmul.
            p = jnp.exp(s - m_new)
            p_sum = jnp.sum(p, axis=-1, keepdims=True)
            pv = jnp.dot(p.astype(v.dtype), v, preferred_element_type=jnp.float32)

        # Dropout on the attention probabilities is identity at inference.
        l_sc[...] = alpha * l_sc[...] + p_sum
        acc_sc[...] = alpha * acc_sc[...] + pv
        m_sc[...] = m_new

        @pl.when(kv == pl.num_programs(kv_axis) - 1)
        def _finalize():
            inv_l = pl.reciprocal(l_sc[...], approx=True)  # EUP slot, not a VPU divide
            out = (acc_sc[...] * inv_l).astype(o_ref.dtype)
            if leading_dim:
                o_ref[0] = out
            else:
                o_ref[...] = out

    return kernel


def _flash_scratch(tq, depth):
    return [
        pltpu.VMEM((tq, 1), jnp.float32),      # running max  m
        pltpu.VMEM((tq, 1), jnp.float32),      # running sum  l
        pltpu.VMEM((tq, depth), jnp.float32),  # running numerator acc
    ]


def _flash_attention_flat(qsrc, ksrc, vsrc, *, B, S, num_heads, depth,
                          q_col0, k_col0, v_col0):
    """Transpose-free attention for depth % 128 == 0.

    qsrc/ksrc/vsrc are (B*S, n*depth) bf16 arrays (possibly the same fused QKV
    array); head h of q lives in depth-column-block q_col0 + h, etc.  Output is
    written straight into a (B*S, num_heads*depth) bf16 buffer (heads already
    concatenated in PyTorch order) that feeds the Wo projection directly.
    """
    tq = _pick_tile(S, (128, 64, 32))
    tk = _pick_tile(S, (256, 512, 128, 64, 32))
    nq, nk = S // tq, S // tk
    scale = 1.0 / math.sqrt(depth)
    kernel = _make_flash_kernel(scale, kv_axis=3, leading_dim=False,
                                exp_bf16=_use_bf16_exp())
    return pl.pallas_call(
        kernel,
        out_shape=jax.ShapeDtypeStruct((B * S, num_heads * depth), jnp.bfloat16),
        grid_spec=pltpu.PrefetchScalarGridSpec(
            num_scalar_prefetch=0,
            grid=(B, num_heads, nq, nk),
            in_specs=[
                pl.BlockSpec((tq, depth), lambda b, h, i, j: (b * nq + i, q_col0 + h)),
                pl.BlockSpec((tk, depth), lambda b, h, i, j: (b * nk + j, k_col0 + h)),
                pl.BlockSpec((tk, depth), lambda b, h, i, j: (b * nk + j, v_col0 + h)),
            ],
            out_specs=pl.BlockSpec((tq, depth), lambda b, h, i, j: (b * nq + i, h)),
            scratch_shapes=_flash_scratch(tq, depth),
        ),
        compiler_params=pltpu.CompilerParams(
            dimension_semantics=("parallel", "parallel", "parallel", "arbitrary"),
            vmem_limit_bytes=_vmem_limit_bytes(),
        ),
    )(qsrc, ksrc, vsrc)


def _flash_attention_headmajor(qh, kh, vh):
    """General-depth fallback: qh/kh/vh are head-major (B*H, S, depth) bf16.

    NOTE: per-head depth < 128 fills the MXU N dim only partially and forces
    masked partial stores; prefer configs with depth a multiple of 128 (or pack
    heads) so the transpose-free lane-dense path above is taken.
    """
    BH, S, depth = qh.shape
    tq = _pick_tile(S, (128, 64, 32))
    tk = _pick_tile(S, (256, 512, 128, 64, 32))
    scale = 1.0 / math.sqrt(depth)
    kernel = _make_flash_kernel(scale, kv_axis=2, leading_dim=True,
                                exp_bf16=_use_bf16_exp())
    return pl.pallas_call(
        kernel,
        out_shape=jax.ShapeDtypeStruct((BH, S, depth), jnp.bfloat16),
        grid_spec=pltpu.PrefetchScalarGridSpec(
            num_scalar_prefetch=0,
            grid=(BH, S // tq, S // tk),
            in_specs=[
                pl.BlockSpec((1, tq, depth), lambda b, i, j: (b, i, 0)),
                pl.BlockSpec((1, tk, depth), lambda b, i, j: (b, j, 0)),
                pl.BlockSpec((1, tk, depth), lambda b, i, j: (b, j, 0)),
            ],
            out_specs=pl.BlockSpec((1, tq, depth), lambda b, i, j: (b, i, 0)),
            scratch_shapes=_flash_scratch(tq, depth),
        ),
        compiler_params=pltpu.CompilerParams(
            dimension_semantics=("parallel", "parallel", "arbitrary"),
            vmem_limit_bytes=_vmem_limit_bytes(),
        ),
    )(qh, kh, vh)


# -----------------------------------------------------------------------------
# Full MultiHeadAttention forward.
# -----------------------------------------------------------------------------
def multi_head_attention(q, k, v, params, num_heads):
    """q, k, v: (B, S, d_model). Returns (B, S, d_model). mask=None, dropout=eval."""
    B, S, D = q.shape
    assert D % num_heads == 0
    depth = D // num_heads
    self_attn = (q is k) and (q is v)

    # ---- Q/K/V projections (bf16 MXU inputs, f32 accumulate + bias, bf16 out) ----
    if self_attn:
        # Fused QKV: the activation is read from HBM once; one wide lane-dense store.
        w_qkv = jnp.concatenate(
            [params["wq"], params["wk"], params["wv"]], axis=1).astype(jnp.bfloat16)
        b_qkv = jnp.concatenate([params["bq"], params["bk"], params["bv"]], axis=1)
        qkv = _linear(q.reshape(B * S, D), w_qkv, b_qkv, out_dtype=jnp.bfloat16)
        qp = kp = vp = None
    else:
        qkv = None
        qp = _linear(q.reshape(B * S, D), params["wq"].astype(jnp.bfloat16),
                     params["bq"], out_dtype=jnp.bfloat16)
        kp = _linear(k.reshape(B * S, D), params["wk"].astype(jnp.bfloat16),
                     params["bk"], out_dtype=jnp.bfloat16)
        vp = _linear(v.reshape(B * S, D), params["wv"].astype(jnp.bfloat16),
                     params["bv"], out_dtype=jnp.bfloat16)

    # ---- attention core ----
    transpose_free = (depth % 128 == 0) and (S % 8 == 0)
    if transpose_free:
        # Heads indexed directly out of the flattened projection output; attention
        # result written straight into a (B*S, D) buffer -> no XLA head transposes.
        if self_attn:
            attn2d = _flash_attention_flat(
                qkv, qkv, qkv, B=B, S=S, num_heads=num_heads, depth=depth,
                q_col0=0, k_col0=num_heads, v_col0=2 * num_heads)
        else:
            attn2d = _flash_attention_flat(
                qp, kp, vp, B=B, S=S, num_heads=num_heads, depth=depth,
                q_col0=0, k_col0=0, v_col0=0)
    else:
        # General-depth fallback: head-major layout via wrapper transposes (bf16).
        if self_attn:
            qkv4 = qkv.reshape(B, S, 3, num_heads, depth)
            qp, kp, vp = qkv4[:, :, 0], qkv4[:, :, 1], qkv4[:, :, 2]

            def to_heads(x):
                return x.transpose(0, 2, 1, 3).reshape(B * num_heads, S, depth)
        else:
            def to_heads(x):
                return (x.reshape(B, S, num_heads, depth)
                        .transpose(0, 2, 1, 3).reshape(B * num_heads, S, depth))

        attn = _flash_attention_headmajor(to_heads(qp), to_heads(kp), to_heads(vp))
        attn2d = (attn.reshape(B, num_heads, S, depth)
                  .transpose(0, 2, 1, 3).reshape(B * S, D))

    # ---- output projection (f32 out) ----
    out = _linear(attn2d, params["wo"].astype(jnp.bfloat16), params["bo"],
                  out_dtype=jnp.float32)
    return out.reshape(B, S, D).astype(q.dtype)


# -----------------------------------------------------------------------------
# Pure-JAX f32 reference mirroring the PyTorch forward (mask=None, eval mode).
# -----------------------------------------------------------------------------
def _reference(q, k, v, params, num_heads):
    B, S, D = q.shape
    depth = D // num_heads

    def proj(x, w, b):
        return x @ w + b[0]

    qp = proj(q, params["wq"], params["bq"]).reshape(B, S, num_heads, depth).transpose(0, 2, 1, 3)
    kp = proj(k, params["wk"], params["bk"]).reshape(B, S, num_heads, depth).transpose(0, 2, 1, 3)
    vp = proj(v, params["wv"], params["bv"]).reshape(B, S, num_heads, depth).transpose(0, 2, 1, 3)
    scores = jnp.einsum("bhqd,bhkd->bhqk", qp, kp) / np.sqrt(depth)
    scores = jax.nn.softmax(scores, axis=-1)
    out = jnp.einsum("bhqk,bhkd->bhqd", scores, vp)
    out = out.transpose(0, 2, 1, 3).reshape(B, S, D)
    return proj(out, params["wo"], params["bo"])


def _make_params(key, D):
    keys = jax.random.split(key, 8)
    scale = 1.0 / math.sqrt(D)
    return {
        "wq": jax.random.normal(keys[0], (D, D), jnp.float32) * scale,
        "bq": jax.random.normal(keys[1], (1, D), jnp.float32) * 0.01,
        "wk": jax.random.normal(keys[2], (D, D), jnp.float32) * scale,
        "bk": jax.random.normal(keys[3], (1, D), jnp.float32) * 0.01,
        "wv": jax.random.normal(keys[4], (D, D), jnp.float32) * scale,
        "bv": jax.random.normal(keys[5], (1, D), jnp.float32) * 0.01,
        "wo": jax.random.normal(keys[6], (D, D), jnp.float32) * scale,
        "bo": jax.random.normal(keys[7], (1, D), jnp.float32) * 0.01,
    }


if __name__ == "__main__":
    key = jax.random.PRNGKey(0)
    k_params1, k_q, k_k, k_v, k_params2, k_x = jax.random.split(key, 6)

    # --- Test 1: small shapes, distinct q/k/v -> separate projections + head-major
    #             fallback path (batch=2, seq=8, d_model=32, heads=4, depth=8).
    B, S, D, H = 2, 8, 32, 4
    params1 = _make_params(k_params1, D)
    q = jax.random.normal(k_q, (B, S, D), jnp.float32)
    k = jax.random.normal(k_k, (B, S, D), jnp.float32)
    v = jax.random.normal(k_v, (B, S, D), jnp.float32)

    out1 = jax.block_until_ready(multi_head_attention(q, k, v, params1, H))
    ref1 = jax.block_until_ready(_reference(q, k, v, params1, H))
    np.testing.assert_allclose(np.asarray(out1), np.asarray(ref1), rtol=5e-2, atol=5e-2)

    # --- Test 2: self-attention with depth=128 -> fused QKV projection + the
    #             transpose-free lane-dense flash path (B=2, S=128, D=256, H=2).
    B2, S2, D2, H2 = 2, 128, 256, 2
    params2 = _make_params(k_params2, D2)
    x = jax.random.normal(k_x, (B2, S2, D2), jnp.float32)

    out2 = jax.block_until_ready(multi_head_attention(x, x, x, params2, H2))
    ref2 = jax.block_until_ready(_reference(x, x, x, params2, H2))
    # bf16 projections / attention core (f32 accumulation) -> loose tolerance vs f32 ref.
    np.testing.assert_allclose(np.asarray(out2), np.asarray(ref2), rtol=5e-2, atol=5e-2)

    print("KERNEL_OK")
</pallas_src>

<mosaic_0001>
module attributes {stable_mosaic.version = 11 : i64} {
  func.func @_linear_kernel(%arg0: i32, %arg1: i32, %arg2: memref<16x32xf32, #tpu.memory_space<vmem>>, %arg3: memref<32x32xbf16, #tpu.memory_space<vmem>>, %arg4: memref<1x32xf32, #tpu.memory_space<vmem>>, %arg5: memref<16x32xbf16, #tpu.memory_space<vmem>>) attributes {dimension_semantics = [#tpu.dimension_semantics<parallel>, #tpu.dimension_semantics<parallel>], iteration_bounds = array<i64: 1, 1>, scalar_prefetch = 0 : i64, scratch_operands = 0 : i64, tpu.core_type = #tpu.core_type<tc>, window_params = [{transform_indices = @transform_0, window_bounds = array<i64: 16, 32>}, {pipeline_mode = #tpu.pipeline_mode<synchronous>, transform_indices = @transform_1, window_bounds = array<i64: 32, 32>}, {pipeline_mode = #tpu.pipeline_mode<synchronous>, transform_indices = @transform_2, window_bounds = array<i64: 1, 32>}, {transform_indices = @transform_3, window_bounds = array<i64: 16, 32>}]} {
    %c0 = arith.constant 0 : index
    %c0_0 = arith.constant 0 : index
    %0 = vector.load %arg2[%c0, %c0_0] : memref<16x32xf32, #tpu.memory_space<vmem>>, vector<16x32xf32>
    %1 = arith.truncf %0 : vector<16x32xf32> to vector<16x32xbf16>
    %c0_1 = arith.constant 0 : index
    %c0_2 = arith.constant 0 : index
    %2 = vector.load %arg3[%c0_1, %c0_2] : memref<32x32xbf16, #tpu.memory_space<vmem>>, vector<32x32xbf16>
    %cst = arith.constant dense<0.000000e+00> : vector<16x32xf32>
    %3 = tpu.matmul %1, %2, %cst {dimension_numbers = #tpu.dot_dimension_numbers<[1], [0], [0], [1], [0, 0, 1, 1], [], []>} : vector<16x32xbf16>, vector<32x32xbf16>, vector<16x32xf32> -> vector<16x32xf32>
    %c0_3 = arith.constant 0 : index
    %c0_4 = arith.constant 0 : index
    %4 = vector.load %arg4[%c0_3, %c0_4] : memref<1x32xf32, #tpu.memory_space<vmem>>, vector<1x32xf32>
    %5 = vector.broadcast %4 : vector<1x32xf32> to vector<16x32xf32>
    %6 = arith.addf %3, %5 : vector<16x32xf32>
    %7 = arith.truncf %6 : vector<16x32xf32> to vector<16x32xbf16>
    %c0_5 = arith.constant 0 : index
    %c0_6 = arith.constant 0 : index
    %8 = vector.load %arg5[%c0_5, %c0_6] : memref<16x32xbf16, #tpu.memory_space<vmem>>, vector<16x32xbf16>
    tpu.vector_store %arg5[%c0_5, %c0_6], %7 {strides = array<i32>} : memref<16x32xbf16, #tpu.memory_space<vmem>>, vector<16x32xbf16>,
    return
  }
  func.func @transform_0(%arg0: i32, %arg1: i32) -> (i32, i32) {
    %c0_i32 = arith.constant 0 : i32
    %c0_i32_0 = arith.constant 0 : i32
    return %arg1, %c0_i32 : i32, i32
  }
  func.func @transform_1(%arg0: i32, %arg1: i32) -> (i32, i32) {
    %c0_i32 = arith.constant 0 : i32
    %c0_i32_0 = arith.constant 0 : i32
    return %c0_i32, %arg0 : i32, i32
  }
  func.func @transform_2(%arg0: i32, %arg1: i32) -> (i32, i32) {
    %c0_i32 = arith.constant 0 : i32
    %c0_i32_0 = arith.constant 0 : i32
    return %c0_i32, %arg0 : i32, i32
  }
  func.func @transform_3(%arg0: i32, %arg1: i32) -> (i32, i32) {
    %c0_i32 = arith.constant 0 : i32
    return %arg1, %arg0 : i32, i32
  }
}

</mosaic_0001>

<bundles_post_ra>
// kernel: tpu_custom_call.1
= control target key start
LH: loop header
LB: loop body
LE: loop exit
PB: predicated region body
PF: predicated region fallthrough
CT: control target
= control target key end

     0   :  { %8 = vsyncpa [#allocation3], 0  ;;  %s320_s0 = inlined_call_operand.hbm [shape: f32[16,32], index: 0, kind: input, shape index: {}]   ;;  %s321_s1 = inlined_call_operand.hbm [shape: bf16[32,32], index: 1, kind: input, shape index: {}]   ;;  %s322_s2 = inlined_call_operand.vmem [shape: f32[1,32], index: 2, kind: input, shape index: {}]   ;;  %s323_s3 = inlined_call_operand.hbm [shape: bf16[16,32], index: 3, kind: output, shape index: {}]  }
   0x1   :  { %9 = vsyncpa [#allocation6], 0 }
   0x2   :  { %10 = vsyncpa [#allocation4], 0  ;;  %s246_s12 = smov [#allocation2]   ;;  %s174_s16 = scalar_lea.hbm %s320_s0, 256 }
   0x3   :  { %s16_s13 = sshll.u32 %s246_s12, 4  ;;  %p175_p0 = scmp.ne.s32.totalorder %s320_s0, %s174_s16  ;;  %s17_s13 = int_to_ptr.vmem [resolvable:$true] %s16_s13 }
   0x4   :  { %p178_p1 = scmp.lt.u32.totalorder %s174_s16, %s320_s0 }
   0x6   :  { %p180_p2 = pnand %p178_p1, %p175_p0 }
   0x8   :  { %183 = shalt.err (!%p180_p2)
}
   0x9   :  { %s184_s21 = scalar_lea.vmem %s17_s13, 256  ;;  %p189_p4 = scmp.lt.s32.totalorder %s17_s13, %s17_s13 }
   0xa   :  { %p185_p3 = scmp.ne.s32.totalorder %s17_s13, %s184_s21  ;;  %p190_p5 = scmp.lt.s32.totalorder %s184_s21, %s184_s21 }
   0xc   :  { %p191_p6 = por %p190_p5, %p189_p4 }
   0xe   :  { %p192_p7 = pnand %p191_p6, %p185_p3 }
  0x10   :  { %195 = shalt.err (!%p192_p7)
}
  0x11   :  { %s247_s22 = smov 128   ;;  %s248_s23 = smov 8  }
  0x12   :  { %22 = dma.hbm_to_vmem [thread:$0]  %s320_s0, 256, %s17_s13, [#allocation3], %s247_s22, %s247_s22, %s248_s23  }
  0x13   :  { %s249_s26 = smov [#allocation5]   ;;  %s196_s30 = scalar_lea.hbm %s321_s1, 256 }
  0x14   :  { %s28_s27 = sshll.u32 %s249_s26, 4  ;;  %p197_p8 = scmp.ne.s32.totalorder %s321_s1, %s196_s30  ;;  %s29_s27 = int_to_ptr.vmem [resolvable:$true] %s28_s27 }
  0x15   :  { %p200_p9 = scmp.lt.u32.totalorder %s196_s30, %s321_s1 }
  0x17   :  { %p202_p10 = pnand %p200_p9, %p197_p8 }
  0x19   :  { %205 = shalt.err (!%p202_p10)
}
  0x1a   :  { %s206_s8 = scalar_lea.vmem %s29_s27, 256  ;;  %p211_p12 = scmp.lt.s32.totalorder %s29_s27, %s29_s27 }
  0x1b   :  { %p207_p11 = scmp.ne.s32.totalorder %s29_s27, %s206_s8  ;;  %p212_p13 = scmp.lt.s32.totalorder %s206_s8, %s206_s8 }
  0x1d   :  { %p213_p0 = por %p212_p13, %p211_p12 }
  0x1f   :  { %p214_p1 = pnand %p213_p0, %p207_p11 }
  0x21   :  { %217 = shalt.err (!%p214_p1)
}
  0x22   :  { %s250_s0 = smov 64   ;;  %s251_s9 = smov 4  }
  0x23   :  { %34 = dma.hbm_to_vmem [thread:$0]  %s321_s1, 256, %s29_s27, [#allocation6], %s250_s0, %s250_s0, %s251_s9  }
  0x24   :  { %240 = dma.done.wait [#allocation3], 256  }
  0x25   :  { %241 = vsyncadd [#allocation3], 4294967040 }
  0x26   :  { %242 = dma.done.wait [#allocation6], 256  }
  0x27   :  { %243 = vsyncadd [#allocation6], 4294967040  ;;  %v252_v0 = vmov 0.0   ;;  %vm253_vm0 = vmmov 0   ;;  %v172_v1 = vld [vmem:[#allocation5] sm:$0xff]   ;;  %v173_v2 = vld [vmem:[#allocation5 + $0x8] sm:$0xff]  }
  0x28   :  { %155 = vmatprep.subr.bf16.mxu0 %v252_v0  ;;  %159 = vmatprep.mubr.msk.bf16.mxu0 %vm253_vm0, %v252_v0  ;;  %v44_v3 = vld [vmem:[#allocation2] sm:$0xff]  ;;  %v45_v4 = vld [vmem:[#allocation2 + $0x8] sm:$0xff]  ;;  %vm70_vm1 = vcmask 261120   ;;  %vm123_vm2 = vcmask 257024   ;;  %s254_s13 = smov [#allocation7]  }
  0x29   :  { %156 = vmatpush3.bf16.msra.mxu0 %v172_v1  ;;  %v46_v5 = vpack.c.bf16 %v45_v4, %v44_v3  ;;  %v144_v6 = vld [vmem:[%s322_s2] ss:$0 sm:$0xff]  ;;  %s131_s14 = sshll.u32 %s254_s13, 4  ;;  %s132_s14 = int_to_ptr.vmem [resolvable:$true] %s131_s14 }
  0x2a   :  { %157 = vmatprep.subr.bf16.mxu0 %v252_v0  ;;  %s218_s15 = scalar_lea.vmem %s132_s14, 128  ;;  %p223_p3 = scmp.lt.s32.totalorder %s132_s14, %s132_s14 }
  0x2b   :  { %p219_p2 = scmp.ne.s32.totalorder %s132_s14, %s218_s15  ;;  %p224_p4 = scmp.lt.s32.totalorder %s218_s15, %s218_s15 }
  0x2d   :  { %158 = vmatpush3.bf16.msra.mxu0 %v173_v2  ;;  %p225_p5 = por %p224_p4, %p223_p3 }
  0x2f   :  { %p226_p6 = pnand %p225_p5, %p219_p2 }
  0x30   :  { %160 = vmatmul.mubr.msk.bf16.vlgmr.msra.gmra.mrb[0].mxu0 %vm70_vm1, %v46_v5 }
 0x103   :  { %v108_v7 = vpop.f32.mrb[0].mxu0 }
 0x104   :  { %v109_v8 = vadd.f32 %v144_v6, %v108_v7  ;;  %v161_v9 = vpop.f32.mrb[1].mxu0 }
 0x105   :  { %v111_v10 = vpop.f32.mrb[2].mxu0 }
 0x106   :  { %v150_v11 = vpack.c.bf16 %v109_v8, %v109_v8  ;;  %v112_v12 = vadd.f32 %v144_v6, %v111_v10  ;;  %v162_v13 = vpop.f32.mrb[3].mxu0 }
 0x108   :  { %v151_v14 = vpack.c.bf16 %v112_v12, %v112_v12  ;;  %124 = vst.msk [vmem:[#allocation7] sm:$0xf] %vm123_vm2, %v150_v11 }
 0x10a   :  { %125 = vst.msk [vmem:[#allocation7 + $0x4] sm:$0xf] %vm123_vm2, %v151_v14 }
 0x10b   :  { %229 = shalt.err (!%p226_p6)
}
 0x10c   :  { %s230_s17 = scalar_lea.hbm %s323_s3, 128 }
 0x10d   :  { %p231_p7 = scmp.ne.s32.totalorder %s323_s3, %s230_s17  ;;  %p234_p8 = scmp.lt.u32.totalorder %s230_s17, %s323_s3 }
 0x10f   :  { %p236_p9 = pnand %p234_p8, %p231_p7 }
 0x111   :  { %239 = shalt.err (!%p236_p9)
}
 0x112   :  { %137 = dma.vmem_to_hbm [thread:$0]  %s132_s14, 128, %s323_s3, [#allocation4], %s250_s0, %s250_s0, %s251_s9  }
 0x113   :  { %244 = dma.done.wait [#allocation4], 128  }
 0x114   :  { %245 = vsyncadd [#allocation4], 4294967168 }
 0x115   :  { %141 = vsyncpa [#allocation3], 1 }
 0x116   :  { %142 = vsyncpa [#allocation6], 1 }
 0x117   :  { %143 = vsyncpa [#allocation4], 1 }

</bundles_post_ra>
